<compile_context>
chip_gen: v7x
topology: tpu7x:2x2x1
jax: 0.10.0
libtpu: 0.0.40
codegen_flags: <defaults>
</compile_context>

<pallas_src>
import functools

import jax
import jax.numpy as jnp
from jax.experimental import pallas as pl
from jax.experimental.pallas import tpu as pltpu

SMOOTH = 1e-5
LANES = 128
SUBLANES = 8
NUM_SUMS = 4            # [sum(x), sum(y), sum(x*y), sum(softplus(-x))]
NUM_SHARDS = 2          # leading "parallel" grid axis: shards the element range across
                        # TensorCores on multi-TC chips (v7x/v5p/v4); it is just a
                        # sequential outer loop on single-TC chips (v5e/v6e).
MAX_BLOCK_ROWS = 8192   # (8192,128) f32 tile = 4 MiB; 2 inputs double-buffered stays
                        # well under the raised VMEM limit below on every generation.
VMEM_LIMIT_BYTES = 32 * 1024 * 1024


def _dice_ce_kernel(logits_ref, labels_ref, out_ref, *, n, block_elems, steps):
    c = pl.program_id(0)                  # shard (TensorCore) index
    i = pl.program_id(1)                  # reduction step within the shard
    block_rows = logits_ref.shape[0]

    @pl.when(i == 0)
    def _init():
        out_ref[...] = jnp.zeros_like(out_ref)

    def accumulate(masked):
        z = logits_ref[...].astype(jnp.float32)
        # sigmoid via tanh: 1 EUP op (vs exp + reciprocal); x = sigmoid(z) in [0, 1].
        x = 0.5 * jnp.tanh(0.5 * z) + 0.5
        y = labels_ref[...].astype(jnp.float32)
        sp = jnp.log1p(jnp.exp(-x))       # softplus(-x); stable since x >= 0
        if masked:
            # Only blocks at i == steps-1 can be partial (or, for the clamped
            # duplicate block when num_blocks is odd, fully out of range).  The
            # un-DMA'd part of the VMEM tile holds unspecified data (possibly
            # NaN/Inf), so mask with jnp.where, never with multiply-by-mask.
            gb = i * NUM_SHARDS + c                       # global (unclamped) block idx
            rem = n - gb * block_elems                    # elements remaining; may be <= 0
            # TODO(synk): rem math is int32 -- widen for tensors with >= 2^31 elements.
            r = jax.lax.broadcasted_iota(jnp.int32, (block_rows, LANES), 0)
            l = jax.lax.broadcasted_iota(jnp.int32, (block_rows, LANES), 1)
            valid = (r * LANES + l) < rem                 # within-block flat index < rem
            x = jnp.where(valid, x, 0.0)
            y = jnp.where(valid, y, 0.0)
            sp = jnp.where(valid, sp, 0.0)
        xy = x * y

        def fold(v):  # (block_rows, 128) -> (8, 128): pure VPU adds, no XLU per step
            return jnp.sum(v.reshape(-1, SUBLANES, LANES), axis=0)

        # Output block index is constant across i for a given shard -> the (1,4,8,128)
        # output tile is a resident VMEM accumulator; written back to HBM once per shard.
        out_ref[0, 0] += fold(x)
        out_ref[0, 1] += fold(y)
        out_ref[0, 2] += fold(xy)
        out_ref[0, 3] += fold(sp)

    @pl.when(i < steps - 1)
    def _steady():
        accumulate(False)                 # interior blocks: no masking at all

    @pl.when(i == steps - 1)
    def _tail():
        accumulate(True)


def dice_ce_loss(logits, labels):
    n = logits.size
    assert labels.size == n, "logits and labels must have the same number of elements"

    # Stream native dtypes: no wrapper-side astype / jnp.pad HBM passes.
    lf = logits.reshape(-1)
    yf = labels.reshape(-1)
    if n % LANES != 0:
        # Rare fallback for non-lane-aligned sizes; the small zero pad is masked out
        # in-kernel via the true element count n, so it cannot affect the result.
        pad = LANES - n % LANES
        lf = jnp.pad(lf, (0, pad))
        yf = jnp.pad(yf, (0, pad))
    rows = lf.size // LANES
    lf = lf.reshape(rows, LANES)          # bitcast-level reshape, no extra HBM traffic
    yf = yf.reshape(rows, LANES)

    block_rows = min(MAX_BLOCK_ROWS, ((rows + SUBLANES - 1) // SUBLANES) * SUBLANES)
    block_elems = block_rows * LANES
    num_blocks = pl.cdiv(rows, block_rows)
    steps = pl.cdiv(num_blocks, NUM_SHARDS)
    last_block = num_blocks - 1

    # Shard s processes global blocks gb = i*NUM_SHARDS + s; clamp keeps the index_map
    # in bounds when num_blocks is odd (the duplicate block is fully masked in-kernel).
    def in_map(c, i):
        return (jnp.minimum(i * NUM_SHARDS + c, last_block), 0)

    kernel = functools.partial(
        _dice_ce_kernel, n=n, block_elems=block_elems, steps=steps)

    out = pl.pallas_call(
        kernel,
        out_shape=jax.ShapeDtypeStruct(
            (NUM_SHARDS, NUM_SUMS, SUBLANES, LANES), jnp.float32),
        grid_spec=pltpu.PrefetchScalarGridSpec(
            num_scalar_prefetch=0,
            grid=(NUM_SHARDS, steps),
            in_specs=[
                pl.BlockSpec((block_rows, LANES), in_map),
                pl.BlockSpec((block_rows, LANES), in_map),
            ],
            out_specs=pl.BlockSpec(
                (1, NUM_SUMS, SUBLANES, LANES), lambda c, i: (c, 0, 0, 0)),
        ),
        compiler_params=pltpu.CompilerParams(
            dimension_semantics=("parallel", "arbitrary"),
            vmem_limit_bytes=VMEM_LIMIT_BYTES),
        cost_estimate=pl.CostEstimate(
            flops=10 * n,
            transcendentals=3 * n,
            bytes_accessed=n * (logits.dtype.itemsize + labels.dtype.itemsize)
            + NUM_SHARDS * NUM_SUMS * SUBLANES * LANES * 4),
    )(lf, yf)

    # Tiny epilogue in the wrapper: combine per-shard partials and do the scalar math.
    s = jnp.sum(out, axis=(0, 2, 3))      # (4,) = [sum_x, sum_y, sum_xy, sum_softplus]
    s_x, s_y, s_xy, s_sp = s[0], s[1], s[2], s[3]
    bce = (s_x - s_xy + s_sp) / n         # sum(x - x*y + softplus(-x)) / N
    dice = 1.0 - (2.0 * s_xy + SMOOTH) / (s_x + s_y + SMOOTH)
    return bce + dice


def _reference(logits, labels):
    x = jax.nn.sigmoid(logits.astype(jnp.float32)).reshape(-1)
    y = labels.astype(jnp.float32).reshape(-1)
    bce = jnp.mean(jnp.maximum(x, 0.0) - x * y + jnp.log1p(jnp.exp(-jnp.abs(x))))
    inter = jnp.sum(x * y)
    num = 2.0 * inter + SMOOTH
    den = jnp.sum(x) + jnp.sum(y) + SMOOTH
    return bce + (1.0 - num / den)


if __name__ == "__main__":
    key = jax.random.PRNGKey(0)
    k1, k2 = jax.random.split(key)
    # Small shape consistent with a segmentation-style loss: N=2, C=4, H=W=16.
    logits = jax.random.normal(k1, (2, 4, 16, 16), dtype=jnp.float32)
    labels = (jax.random.uniform(k2, (2, 4, 16, 16)) > 0.5).astype(jnp.int32)

    loss = jax.block_until_ready(jax.jit(dice_ce_loss)(logits, labels))
    ref = jax.block_until_ready(_reference(logits, labels))

    assert jnp.allclose(loss, ref, rtol=1e-5, atol=1e-5), (loss, ref)
    print("KERNEL_OK")
</pallas_src>

<mosaic_0001>
module attributes {stable_mosaic.version = 11 : i64} {
  func.func @_dice_ce_kernel(%arg0: i32, %arg1: i32, %arg2: memref<16x128xf32, #tpu.memory_space<vmem>>, %arg3: memref<16x128xi32, #tpu.memory_space<vmem>>, %arg4: memref<1x4x8x128xf32, #tpu.memory_space<vmem>>) attributes {dimension_semantics = [#tpu.dimension_semantics<parallel>, #tpu.dimension_semantics<arbitrary>], iteration_bounds = array<i64: 2, 1>, scalar_prefetch = 0 : i64, scratch_operands = 0 : i64, tpu.core_type = #tpu.core_type<tc>, window_params = [{transform_indices = @transform_0, window_bounds = array<i64: 16, 128>}, {transform_indices = @transform_1, window_bounds = array<i64: 16, 128>}, {transform_indices = @transform_2, window_bounds = array<i64: 1, 4, 8, 128>}]} {
    %c0_i32 = arith.constant 0 : i32
    %0 = arith.cmpi eq, %arg1, %c0_i32 : i32
    %1 = arith.extui %0 : i1 to i32
    %c0_i32_0 = arith.constant 0 : i32
    %2 = arith.cmpi ne, %1, %c0_i32_0 : i32
    scf.if %2 {
      %cst = arith.constant 0.000000e+00 : f32
      %9 = vector.broadcast %cst : f32 to vector<1x4x8x128xf32>
      %c0 = arith.constant 0 : index
      %c0_5 = arith.constant 0 : index
      %c0_6 = arith.constant 0 : index
      %c0_7 = arith.constant 0 : index
      %10 = vector.load %arg4[%c0, %c0_5, %c0_6, %c0_7] : memref<1x4x8x128xf32, #tpu.memory_space<vmem>>, vector<1x4x8x128xf32>
      tpu.vector_store %arg4[%c0, %c0_5, %c0_6, %c0_7], %9 {strides = array<i32>} : memref<1x4x8x128xf32, #tpu.memory_space<vmem>>, vector<1x4x8x128xf32>,
    } else {
    }
    %c0_i32_1 = arith.constant 0 : i32
    %3 = arith.cmpi slt, %arg1, %c0_i32_1 : i32
    %4 = arith.extui %3 : i1 to i32
    %c0_i32_2 = arith.constant 0 : i32
    %5 = arith.cmpi ne, %4, %c0_i32_2 : i32
    scf.if %5 {
      %c0 = arith.constant 0 : index
      %c0_5 = arith.constant 0 : index
      %9 = vector.load %arg2[%c0, %c0_5] : memref<16x128xf32, #tpu.memory_space<vmem>>, vector<16x128xf32>
      %cst = arith.constant 5.000000e-01 : f32
      %10 = vector.broadcast %cst : f32 to vector<16x128xf32>
      %11 = arith.mulf %10, %9 : vector<16x128xf32>
      %12 = math.tanh %11 : vector<16x128xf32>
      %cst_6 = arith.constant 5.000000e-01 : f32
      %13 = vector.broadcast %cst_6 : f32 to vector<16x128xf32>
      %14 = arith.mulf %13, %12 : vector<16x128xf32>
      %cst_7 = arith.constant 5.000000e-01 : f32
      %15 = vector.broadcast %cst_7 : f32 to vector<16x128xf32>
      %16 = arith.addf %14, %15 : vector<16x128xf32>
      %c0_8 = arith.constant 0 : index
      %c0_9 = arith.constant 0 : index
      %17 = vector.load %arg3[%c0_8, %c0_9] : memref<16x128xi32, #tpu.memory_space<vmem>>, vector<16x128xi32>
      %18 = arith.sitofp %17 : vector<16x128xi32> to vector<16x128xf32>
      %cst_10 = arith.constant 0.000000e+00 : f32
      %19 = vector.broadcast %cst_10 : f32 to vector<16x128xf32>
      %20 = arith.subf %19, %16 : vector<16x128xf32>
      %21 = math.exp %20 : vector<16x128xf32>
      %22 = math.log1p %21 : vector<16x128xf32>
      %23 = arith.mulf %16, %18 : vector<16x128xf32>
      %c0_11 = arith.constant 0 : index
      %c0_12 = arith.constant 0 : index
      %c0_13 = arith.constant 0 : index
      %c0_14 = arith.constant 0 : index
      %24 = vector.load %arg4[%c0_11, %c0_12, %c0_13, %c0_14] : memref<1x4x8x128xf32, #tpu.memory_space<vmem>>, vector<1x1x8x128xf32>
      %25 = vector.shape_cast %24 : vector<1x1x8x128xf32> to vector<8x128xf32>
      %26 = vector.shape_cast %16 : vector<16x128xf32> to vector<2x8x128xf32>
      %cst_15 = arith.constant dense<0.000000e+00> : vector<8x128xf32>
      %27 = vector.multi_reduction <add>, %26, %cst_15 [0] : vector<2x8x128xf32> to vector<8x128xf32>
      %28 = arith.addf %25, %27 : vector<8x128xf32>
      %c0_16 = arith.constant 0 : index
      %c0_17 = arith.constant 0 : index
      %c0_18 = arith.constant 0 : index
      %c0_19 = arith.constant 0 : index
      %29 = vector.load %arg4[%c0_16, %c0_17, %c0_18, %c0_19] : memref<1x4x8x128xf32, #tpu.memory_space<vmem>>, vector<1x1x8x128xf32>
      %30 = vector.shape_cast %29 : vector<1x1x8x128xf32> to vector<8x128xf32>
      %31 = vector.shape_cast %28 : vector<8x128xf32> to vector<1x1x8x128xf32>
      tpu.vector_store %arg4[%c0_16, %c0_17, %c0_18, %c0_19], %31 {strides = array<i32>} : memref<1x4x8x128xf32, #tpu.memory_space<vmem>>, vector<1x1x8x128xf32>,
      %c0_20 = arith.constant 0 : index
      %c1 = arith.constant 1 : index
      %c0_21 = arith.constant 0 : index
      %c0_22 = arith.constant 0 : index
      %32 = vector.load %arg4[%c0_20, %c1, %c0_21, %c0_22] : memref<1x4x8x128xf32, #tpu.memory_space<vmem>>, vector<1x1x8x128xf32>
      %33 = vector.shape_cast %32 : vector<1x1x8x128xf32> to vector<8x128xf32>
      %34 = vector.shape_cast %18 : vector<16x128xf32> to vector<2x8x128xf32>
      %cst_23 = arith.constant dense<0.000000e+00> : vector<8x128xf32>
      %35 = vector.multi_reduction <add>, %34, %cst_23 [0] : vector<2x8x128xf32> to vector<8x128xf32>
      %36 = arith.addf %33, %35 : vector<8x128xf32>
      %c0_24 = arith.constant 0 : index
      %c1_25 = arith.constant 1 : index
      %c0_26 = arith.constant 0 : index
      %c0_27 = arith.constant 0 : index
      %37 = vector.load %arg4[%c0_24, %c1_25, %c0_26, %c0_27] : memref<1x4x8x128xf32, #tpu.memory_space<vmem>>, vector<1x1x8x128xf32>
      %38 = vector.shape_cast %37 : vector<1x1x8x128xf32> to vector<8x128xf32>
      %39 = vector.shape_cast %36 : vector<8x128xf32> to vector<1x1x8x128xf32>
      tpu.vector_store %arg4[%c0_24, %c1_25, %c0_26, %c0_27], %39 {strides = array<i32>} : memref<1x4x8x128xf32, #tpu.memory_space<vmem>>, vector<1x1x8x128xf32>,
      %c0_28 = arith.constant 0 : index
      %c2 = arith.constant 2 : index
      %c0_29 = arith.constant 0 : index
      %c0_30 = arith.constant 0 : index
      %40 = vector.load %arg4[%c0_28, %c2, %c0_29, %c0_30] : memref<1x4x8x128xf32, #tpu.memory_space<vmem>>, vector<1x1x8x128xf32>
      %41 = vector.shape_cast %40 : vector<1x1x8x128xf32> to vector<8x128xf32>
      %42 = vector.shape_cast %23 : vector<16x128xf32> to vector<2x8x128xf32>
      %cst_31 = arith.constant dense<0.000000e+00> : vector<8x128xf32>
      %43 = vector.multi_reduction <add>, %42, %cst_31 [0] : vector<2x8x128xf32> to vector<8x128xf32>
      %44 = arith.addf %41, %43 : vector<8x128xf32>
      %c0_32 = arith.constant 0 : index
      %c2_33 = arith.constant 2 : index
      %c0_34 = arith.constant 0 : index
      %c0_35 = arith.constant 0 : index
      %45 = vector.load %arg4[%c0_32, %c2_33, %c0_34, %c0_35] : memref<1x4x8x128xf32, #tpu.memory_space<vmem>>, vector<1x1x8x128xf32>
      %46 = vector.shape_cast %45 : vector<1x1x8x128xf32> to vector<8x128xf32>
      %47 = vector.shape_cast %44 : vector<8x128xf32> to vector<1x1x8x128xf32>
      tpu.vector_store %arg4[%c0_32, %c2_33, %c0_34, %c0_35], %47 {strides = array<i32>} : memref<1x4x8x128xf32, #tpu.memory_space<vmem>>, vector<1x1x8x128xf32>,
      %c0_36 = arith.constant 0 : index
      %c3 = arith.constant 3 : index
      %c0_37 = arith.constant 0 : index
      %c0_38 = arith.constant 0 : index
      %48 = vector.load %arg4[%c0_36, %c3, %c0_37, %c0_38] : memref<1x4x8x128xf32, #tpu.memory_space<vmem>>, vector<1x1x8x128xf32>
      %49 = vector.shape_cast %48 : vector<1x1x8x128xf32> to vector<8x128xf32>
      %50 = vector.shape_cast %22 : vector<16x128xf32> to vector<2x8x128xf32>
      %cst_39 = arith.constant dense<0.000000e+00> : vector<8x128xf32>
      %51 = vector.multi_reduction <add>, %50, %cst_39 [0] : vector<2x8x128xf32> to vector<8x128xf32>
      %52 = arith.addf %49, %51 : vector<8x128xf32>
      %c0_40 = arith.constant 0 : index
      %c3_41 = arith.constant 3 : index
      %c0_42 = arith.constant 0 : index
      %c0_43 = arith.constant 0 : index
      %53 = vector.load %arg4[%c0_40, %c3_41, %c0_42, %c0_43] : memref<1x4x8x128xf32, #tpu.memory_space<vmem>>, vector<1x1x8x128xf32>
      %54 = vector.shape_cast %53 : vector<1x1x8x128xf32> to vector<8x128xf32>
      %55 = vector.shape_cast %52 : vector<8x128xf32> to vector<1x1x8x128xf32>
      tpu.vector_store %arg4[%c0_40, %c3_41, %c0_42, %c0_43], %55 {strides = array<i32>} : memref<1x4x8x128xf32, #tpu.memory_space<vmem>>, vector<1x1x8x128xf32>,
    } else {
    }
    %c0_i32_3 = arith.constant 0 : i32
    %6 = arith.cmpi eq, %arg1, %c0_i32_3 : i32
    %7 = arith.extui %6 : i1 to i32
    %c0_i32_4 = arith.constant 0 : i32
    %8 = arith.cmpi ne, %7, %c0_i32_4 : i32
    scf.if %8 {
      %c0 = arith.constant 0 : index
      %c0_5 = arith.constant 0 : index
      %9 = vector.load %arg2[%c0, %c0_5] : memref<16x128xf32, #tpu.memory_space<vmem>>, vector<16x128xf32>
      %cst = arith.constant 5.000000e-01 : f32
      %10 = vector.broadcast %cst : f32 to vector<16x128xf32>
      %11 = arith.mulf %10, %9 : vector<16x128xf32>
      %12 = math.tanh %11 : vector<16x128xf32>
      %cst_6 = arith.constant 5.000000e-01 : f32
      %13 = vector.broadcast %cst_6 : f32 to vector<16x128xf32>
      %14 = arith.mulf %13, %12 : vector<16x128xf32>
      %cst_7 = arith.constant 5.000000e-01 : f32
      %15 = vector.broadcast %cst_7 : f32 to vector<16x128xf32>
      %16 = arith.addf %14, %15 : vector<16x128xf32>
      %c0_8 = arith.constant 0 : index
      %c0_9 = arith.constant 0 : index
      %17 = vector.load %arg3[%c0_8, %c0_9] : memref<16x128xi32, #tpu.memory_space<vmem>>, vector<16x128xi32>
      %18 = arith.sitofp %17 : vector<16x128xi32> to vector<16x128xf32>
      %cst_10 = arith.constant 0.000000e+00 : f32
      %19 = vector.broadcast %cst_10 : f32 to vector<16x128xf32>
      %20 = arith.subf %19, %16 : vector<16x128xf32>
      %21 = math.exp %20 : vector<16x128xf32>
      %22 = math.log1p %21 : vector<16x128xf32>
      %c2_i32 = arith.constant 2 : i32
      %23 = arith.muli %arg1, %c2_i32 : i32
      %24 = arith.addi %23, %arg0 : i32
      %c2048_i32 = arith.constant 2048 : i32
      %25 = arith.muli %24, %c2048_i32 : i32
      %c2048_i32_11 = arith.constant 2048 : i32
      %26 = arith.subi %c2048_i32_11, %25 : i32
      %27 = tpu.iota {dimensions = array<i32: 0>} : vector<16x128xi32>
      %28 = tpu.iota {dimensions = array<i32: 1>} : vector<16x128xi32>
      %c128_i32 = arith.constant 128 : i32
      %29 = vector.broadcast %c128_i32 : i32 to vector<16x128xi32>
      %30 = arith.muli %27, %29 : vector<16x128xi32>
      %31 = arith.addi %30, %28 : vector<16x128xi32>
      %32 = vector.broadcast %26 : i32 to vector<16x128xi32>
      %33 = arith.cmpi slt, %31, %32 : vector<16x128xi32>
      %cst_12 = arith.constant 0.000000e+00 : f32
      %34 = vector.broadcast %cst_12 : f32 to vector<16x128xf32>
      %35 = arith.select %33, %16, %34 : vector<16x128xi1>, vector<16x128xf32>
      %cst_13 = arith.constant 0.000000e+00 : f32
      %36 = vector.broadcast %cst_13 : f32 to vector<16x128xf32>
      %37 = arith.select %33, %18, %36 : vector<16x128xi1>, vector<16x128xf32>
      %cst_14 = arith.constant 0.000000e+00 : f32
      %38 = vector.broadcast %cst_14 : f32 to vector<16x128xf32>
      %39 = arith.select %33, %22, %38 : vector<16x128xi1>, vector<16x128xf32>
      %40 = arith.mulf %35, %37 : vector<16x128xf32>
      %c0_15 = arith.constant 0 : index
      %c0_16 = arith.constant 0 : index
      %c0_17 = arith.constant 0 : index
      %c0_18 = arith.constant 0 : index
      %41 = vector.load %arg4[%c0_15, %c0_16, %c0_17, %c0_18] : memref<1x4x8x128xf32, #tpu.memory_space<vmem>>, vector<1x1x8x128xf32>
      %42 = vector.shape_cast %41 : vector<1x1x8x128xf32> to vector<8x128xf32>
      %43 = vector.shape_cast %35 : vector<16x128xf32> to vector<2x8x128xf32>
      %cst_19 = arith.constant dense<0.000000e+00> : vector<8x128xf32>
      %44 = vector.multi_reduction <add>, %43, %cst_19 [0] : vector<2x8x128xf32> to vector<8x128xf32>
      %45 = arith.addf %42, %44 : vector<8x128xf32>
      %c0_20 = arith.constant 0 : index
      %c0_21 = arith.constant 0 : index
      %c0_22 = arith.constant 0 : index
      %c0_23 = arith.constant 0 : index
      %46 = vector.load %arg4[%c0_20, %c0_21, %c0_22, %c0_23] : memref<1x4x8x128xf32, #tpu.memory_space<vmem>>, vector<1x1x8x128xf32>
      %47 = vector.shape_cast %46 : vector<1x1x8x128xf32> to vector<8x128xf32>
      %48 = vector.shape_cast %45 : vector<8x128xf32> to vector<1x1x8x128xf32>
      tpu.vector_store %arg4[%c0_20, %c0_21, %c0_22, %c0_23], %48 {strides = array<i32>} : memref<1x4x8x128xf32, #tpu.memory_space<vmem>>, vector<1x1x8x128xf32>,
      %c0_24 = arith.constant 0 : index
      %c1 = arith.constant 1 : index
      %c0_25 = arith.constant 0 : index
      %c0_26 = arith.constant 0 : index
      %49 = vector.load %arg4[%c0_24, %c1, %c0_25, %c0_26] : memref<1x4x8x128xf32, #tpu.memory_space<vmem>>, vector<1x1x8x128xf32>
      %50 = vector.shape_cast %49 : vector<1x1x8x128xf32> to vector<8x128xf32>
      %51 = vector.shape_cast %37 : vector<16x128xf32> to vector<2x8x128xf32>
      %cst_27 = arith.constant dense<0.000000e+00> : vector<8x128xf32>
      %52 = vector.multi_reduction <add>, %51, %cst_27 [0] : vector<2x8x128xf32> to vector<8x128xf32>
      %53 = arith.addf %50, %52 : vector<8x128xf32>
      %c0_28 = arith.constant 0 : index
      %c1_29 = arith.constant 1 : index
      %c0_30 = arith.constant 0 : index
      %c0_31 = arith.constant 0 : index
      %54 = vector.load %arg4[%c0_28, %c1_29, %c0_30, %c0_31] : memref<1x4x8x128xf32, #tpu.memory_space<vmem>>, vector<1x1x8x128xf32>
      %55 = vector.shape_cast %54 : vector<1x1x8x128xf32> to vector<8x128xf32>
      %56 = vector.shape_cast %53 : vector<8x128xf32> to vector<1x1x8x128xf32>
      tpu.vector_store %arg4[%c0_28, %c1_29, %c0_30, %c0_31], %56 {strides = array<i32>} : memref<1x4x8x128xf32, #tpu.memory_space<vmem>>, vector<1x1x8x128xf32>,
      %c0_32 = arith.constant 0 : index
      %c2 = arith.constant 2 : index
      %c0_33 = arith.constant 0 : index
      %c0_34 = arith.constant 0 : index
      %57 = vector.load %arg4[%c0_32, %c2, %c0_33, %c0_34] : memref<1x4x8x128xf32, #tpu.memory_space<vmem>>, vector<1x1x8x128xf32>
      %58 = vector.shape_cast %57 : vector<1x1x8x128xf32> to vector<8x128xf32>
      %59 = vector.shape_cast %40 : vector<16x128xf32> to vector<2x8x128xf32>
      %cst_35 = arith.constant dense<0.000000e+00> : vector<8x128xf32>
      %60 = vector.multi_reduction <add>, %59, %cst_35 [0] : vector<2x8x128xf32> to vector<8x128xf32>
      %61 = arith.addf %58, %60 : vector<8x128xf32>
      %c0_36 = arith.constant 0 : index
      %c2_37 = arith.constant 2 : index
      %c0_38 = arith.constant 0 : index
      %c0_39 = arith.constant 0 : index
      %62 = vector.load %arg4[%c0_36, %c2_37, %c0_38, %c0_39] : memref<1x4x8x128xf32, #tpu.memory_space<vmem>>, vector<1x1x8x128xf32>
      %63 = vector.shape_cast %62 : vector<1x1x8x128xf32> to vector<8x128xf32>
      %64 = vector.shape_cast %61 : vector<8x128xf32> to vector<1x1x8x128xf32>
      tpu.vector_store %arg4[%c0_36, %c2_37, %c0_38, %c0_39], %64 {strides = array<i32>} : memref<1x4x8x128xf32, #tpu.memory_space<vmem>>, vector<1x1x8x128xf32>,
      %c0_40 = arith.constant 0 : index
      %c3 = arith.constant 3 : index
      %c0_41 = arith.constant 0 : index
      %c0_42 = arith.constant 0 : index
      %65 = vector.load %arg4[%c0_40, %c3, %c0_41, %c0_42] : memref<1x4x8x128xf32, #tpu.memory_space<vmem>>, vector<1x1x8x128xf32>
      %66 = vector.shape_cast %65 : vector<1x1x8x128xf32> to vector<8x128xf32>
      %67 = vector.shape_cast %39 : vector<16x128xf32> to vector<2x8x128xf32>
      %cst_43 = arith.constant dense<0.000000e+00> : vector<8x128xf32>
      %68 = vector.multi_reduction <add>, %67, %cst_43 [0] : vector<2x8x128xf32> to vector<8x128xf32>
      %69 = arith.addf %66, %68 : vector<8x128xf32>
      %c0_44 = arith.constant 0 : index
      %c3_45 = arith.constant 3 : index
      %c0_46 = arith.constant 0 : index
      %c0_47 = arith.constant 0 : index
      %70 = vector.load %arg4[%c0_44, %c3_45, %c0_46, %c0_47] : memref<1x4x8x128xf32, #tpu.memory_space<vmem>>, vector<1x1x8x128xf32>
      %71 = vector.shape_cast %70 : vector<1x1x8x128xf32> to vector<8x128xf32>
      %72 = vector.shape_cast %69 : vector<8x128xf32> to vector<1x1x8x128xf32>
      tpu.vector_store %arg4[%c0_44, %c3_45, %c0_46, %c0_47], %72 {strides = array<i32>} : memref<1x4x8x128xf32, #tpu.memory_space<vmem>>, vector<1x1x8x128xf32>,
    } else {
    }
    return
  }
  func.func @transform_0(%arg0: i32, %arg1: i32) -> (i32, i32) {
    %c2_i32 = arith.constant 2 : i32
    %0 = arith.muli %arg1, %c2_i32 : i32
    %1 = arith.addi %0, %arg0 : i32
    %c0_i32 = arith.constant 0 : i32
    %2 = arith.minsi %1, %c0_i32 : i32
    %c0_i32_0 = arith.constant 0 : i32
    %c0_i32_1 = arith.constant 0 : i32
    return %2, %c0_i32_0 : i32, i32
  }
  func.func @transform_1(%arg0: i32, %arg1: i32) -> (i32, i32) {
    %c2_i32 = arith.constant 2 : i32
    %0 = arith.muli %arg1, %c2_i32 : i32
    %1 = arith.addi %0, %arg0 : i32
    %c0_i32 = arith.constant 0 : i32
    %2 = arith.minsi %1, %c0_i32 : i32
    %c0_i32_0 = arith.constant 0 : i32
    %c0_i32_1 = arith.constant 0 : i32
    return %2, %c0_i32_0 : i32, i32
  }
  func.func @transform_2(%arg0: i32, %arg1: i32) -> (i32, i32, i32, i32) {
    %c0_i32 = arith.constant 0 : i32
    %c0_i32_0 = arith.constant 0 : i32
    %c0_i32_1 = arith.constant 0 : i32
    %c0_i32_2 = arith.constant 0 : i32
    return %arg0, %c0_i32, %c0_i32_0, %c0_i32_1 : i32, i32, i32, i32
  }
}

</mosaic_0001>

<bundles_post_ra>
// kernel: dice_ce_loss.1
= control target key start
LH: loop header
LB: loop body
LE: loop exit
PB: predicated region body
PF: predicated region fallthrough
CT: control target
= control target key end

     0   :  { %s569_s9 = smov 0   ;;  %s571_s10 = smov 0   ;;  %s631_s0 = inlined_call_operand.vmem [shape: f32[16,128], index: 0, kind: input, shape index: {}]   ;;  %s632_s1 = inlined_call_operand.vmem [shape: s32[16,128], index: 1, kind: input, shape index: {}]   ;;  %s633_s2 = inlined_call_operand.vmem [shape: f32[2,4,8,128], index: 2, kind: output, shape index: {}]  }
   0x1   :  { %s573_s11 = smov 0  }
   0x2 LB: > { %s24_s12 = sadd.s32 1, %s548_s10  ;;  %p470_p0 = scmp.ge.s32.totalorder %s552_s11, 1  ;;  %s552_s11 = sphi %s573_s11, %s12_s11   ;;  %s548_s10 = sphi %s571_s10, %s639_s10   ;;  %s544_s9 = sphi %s569_s9, %s638_s9  }
   0x3   : > { %p26_p1 = scmp.ge.s32.totalorder %s24_s12, 2  ;;  %p168_p2 = scmp.lt.s32.totalorder %s552_s11, 3 }
   0x5   : > { %s641_s12 = smov (%p26_p1, %s24_s12), 0  ;;  %p169_p3 = pnand %p470_p0, %p168_p2 }
   0x6   : > { %p205_p4 = scmp.lt.s32.totalorder (!%p169_p3), %s544_s9, 0  ;;  %v352_v0 = vlaneseq (!%p169_p3)  ;;  %s483_s13 = sshll.u32 (!%p169_p3), %s544_s9, 11 }
   0x7   : > { %172 = sbr.rel (%p169_p3) target bundleno = 76 (0x4c), region = 28  ;;  %p231_p5 = scmp.lt.s32.totalorder (!%p169_p3), %s544_s9, 1 }
   0x8   : > { %v353_v1 = vshrl.u32 (!%p169_p3), %v352_v0, 7  ;;  %v356_v3 = vand.u32 (!%p169_p3), 127, %v352_v0  ;;  %s351_s16 = ssub.s32 (!%p169_p3), 2048, %s483_s13 }
   0x9   : > { %v361_v8 = vstv (!%p169_p3), %s351_s16 }
   0xa   : > { %v354_v2 = vadd.s32 (!%p169_p3), 8, %v353_v1  ;;  %v357_v4 = vmul.u32 (!%p169_p3), 128, %v353_v1 }
   0xc   : > { %v358_v5 = vmul.u32 (!%p169_p3), 128, %v354_v2  ;;  %v359_v6 = vadd.s32 (!%p169_p3), %v357_v4, %v356_v3 }
   0xe   : > { %s206_s14 = scalar_select %p205_p4, %s544_s9, 0  ;;  %v360_v7 = vadd.s32 %v358_v5, %v356_v3  ;;  %vm593_vm0 = vcmp.lt.s32.totalorder %v359_v6, %v361_v8 }
   0xf   : > { %s645_s9 = smov (!%p231_p5, %s544_s9), 1 }
  0x10   : > { %s471_s15 = sshll.u32 %s206_s14, 1  ;;  %vm597_vm1 = vcmp.lt.s32.totalorder %v360_v7, %v361_v8  ;;  %s492_s24 = sshll.u32 %s645_s9, 5 }
  0x11   : > { %p208_p6 = scmp.lt.s32.totalorder %s471_s15, 1  ;;  %s608_s27 = scalar_lea.vmem %s633_s2, %s492_s24 }
  0x13   : > { %s643_s15 = smov (!%p208_p6, %s471_s15), 1 }
  0x14   : > { %s472_s17 = sshll.u32 %s643_s15, 3 }
  0x15   : > { %s211_s20 = scalar_lea.vmem %s631_s0, %s472_s17  ;;  %s225_s23 = scalar_lea.vmem %s632_s1, %s472_s17 }
  0x16   : > { %v310_v9 = vld [vmem:[%s211_s20] sm:$0xff]  ;;  %v311_v10 = vld [vmem:[%s211_s20 + $0x8] sm:$0xff] }
  0x17   : > { %v320_v12 = vld [vmem:[%s225_s23] sm:$0xff]  ;;  %v312_v13 = vmul.f32 0.5, %v310_v9  ;;  %v313_v14 = vmul.f32 0.5, %v311_v10  ;;  %v321_v16 = vld [vmem:[%s225_s23 + $0x8] sm:$0xff] }
  0x18   : > { %v322_v17 = vcvt.s32.f32 %v320_v12  ;;  %v323_v18 = vcvt.s32.f32 %v321_v16 }
  0x19   : > { %518 = vtanh.f32 %v312_v13 }
  0x1a   : > { %520 = vtanh.f32 %v313_v14  ;;  %v366_v19 = vsel %vm593_vm0, %v322_v17, 0.0  ;;  %v367_v20 = vsel %vm597_vm1, %v323_v18, 0.0 }
  0x1b   : > { %v378_v21 = vadd.f32 %v367_v20, %v366_v19 }
  0x1d   : > { %485 = vst [vmem:[%s608_s27 + $0x8] sm:$0xff] %v378_v21 }
  0x23   : > { %v519_v22 = vpop.eup %518 }
  0x24   : > { %v521_v23 = vpop.eup %520  ;;  %v316_v24 = vmul.f32 0.5, %v519_v22 }
  0x25   : > { %v317_v25 = vmul.f32 0.5, %v521_v23 }
  0x26   : > { %v318_v26 = vadd.f32 0.5, %v316_v24 }
  0x27   : > { %v319_v27 = vadd.f32 0.5, %v317_v25 }
  0x28   : > { %v324_v28 = vsub.f32 0.0, %v318_v26  ;;  %v364_v29 = vsel %vm593_vm0, %v318_v26, 0.0 }
  0x29   : > { %v325_v30 = vsub.f32 0.0, %v319_v27  ;;  %v365_v31 = vsel %vm597_vm1, %v319_v27, 0.0  ;;  %v370_v32 = vmul.f32 %v366_v19, %v364_v29 }
  0x2a   : > { %v326_v33 = vmul.f32 1.442695, %v324_v28  ;;  %v373_v34 = vadd.f32 %v365_v31, %v364_v29  ;;  %v371_v35 = vmul.f32 %v367_v20, %v365_v31 }
  0x2b   : > { %v328_v36 = vmul.f32 1.442695, %v325_v30 }
  0x2c   : > { %522 = vpow2.f32 %v326_v33  ;;  %v383_v37 = vadd.f32 %v371_v35, %v370_v32  ;;  %375 = vst [vmem:[%s608_s27] sm:$0xff] %v373_v34 }
  0x2d   : > { %524 = vpow2.f32 %v328_v36 }
  0x2e   : > { %487 = vst [vmem:[%s608_s27 + $0x10] sm:$0xff] %v383_v37 }
  0x36   : > { %v523_v38 = vpop.eup %522 }
  0x37   : > { %v525_v39 = vpop.eup %524  ;;  %v330_v40 = vadd.f32 1.0, %v523_v38  ;;  %v333_v42 = vmul.f32 -0.5, %v523_v38  ;;  %v336_v45 = vand.u32 2147483647, %v523_v38 }
  0x38   : > { %v339_v41 = vadd.f32 1.0, %v525_v39  ;;  %v342_v43 = vmul.f32 -0.5, %v525_v39  ;;  %v345_v47 = vand.u32 2147483647, %v525_v39 }
  0x39   : > { %526 = vlog2.f32 %v330_v40  ;;  %v334_v44 = vadd.f32 1.0, %v333_v42  ;;  %vm337_vm2 = vcmp.lt.f32.partialorder %v336_v45, 0.0004427343 }
  0x3a   : > { %528 = vlog2.f32 %v339_v41  ;;  %v343_v46 = vadd.f32 1.0, %v342_v43  ;;  %vm346_vm3 = vcmp.lt.f32.partialorder %v345_v47, 0.0004427343 }
  0x3b   : > { %v335_v48 = vmul.f32 %v523_v38, %v334_v44 }
  0x3c   : > { %v344_v50 = vmul.f32 %v525_v39, %v343_v46 }
  0x43   : > { %v527_v49 = vpop.eup %526 }
  0x44   : > { %v529_v51 = vpop.eup %528  ;;  %v332_v52 = vmul.f32 0.6931472, %v527_v49 }
  0x45   : > { %v341_v53 = vmul.f32 0.6931472, %v529_v51 }
  0x46   : > { %v338_v54 = vsel %vm337_vm2, %v335_v48, %v332_v52 }
  0x47   : > { %v347_v55 = vsel %vm346_vm3, %v344_v50, %v341_v53  ;;  %v368_v56 = vsel %vm593_vm0, %v338_v54, 0.0 }
  0x48   : > { %v369_v57 = vsel %vm597_vm1, %v347_v55, 0.0 }
  0x49   : > { %v388_v58 = vadd.f32 %v369_v57, %v368_v56 }
  0x4b   : > { %489 = vst [vmem:[%s608_s27 + $0x18] sm:$0xff] %v388_v58 }
  0x4c PF: > { %s12_s11 = sadd.s32 1, %s552_s11   ;;  %s638_s9 = smov %s548_s10 }
  0x4d   : > { %p9_p7 = scmp.ge.s32.totalorder %s12_s11, 4   ;;  %s639_s10 = smov %s641_s12 }
  0x4f   :  { %11 = sbr.rel (!%p9_p7) target bundleno = 2 (0x2), region = 79 }

</bundles_post_ra>
